<compile_context>
chip_gen: v7x
topology: tpu7x:2x2x1
jax: 0.10.0
libtpu: 0.0.40
codegen_flags: <defaults>
</compile_context>

<pallas_src>
import functools

import numpy as np

import jax
import jax.numpy as jnp
from jax.experimental import pallas as pl
from jax.experimental.pallas import tpu as pltpu


DPAD = 128  # lane-dense padded feature width (all layer dims <= 128 here)


# ----------------------------- Pallas kernel --------------------------------

def _fused_gcn_kernel(adj_ref, x_ref, w_ref, b_ref, o_ref, x_scr, *,
                      num_layers, negative_slope):
    """All GraphConv layers fused; activations stay resident in VMEM.

    adj_ref: [Npad, Npad]       bf16  dense adjacency A[dst, src]
    x_ref:   [Npad, DPAD]       f32   zero-padded node features
    w_ref:   [L, 2*DPAD, DPAD]  bf16  per-layer stacked [lin_src.T ; lin_dst.T]
    b_ref:   [L, 1, DPAD]       f32   per-layer bias
    o_ref:   [Npad, DPAD]       f32   padded output features
    x_scr:   [Npad, DPAD]       bf16  inter-layer activation scratch
    """
    for l in range(num_layers):              # static unroll (num_layers small)
        # Layer 0 reads the f32 input directly (no initial scratch copy);
        # later layers read the bf16 scratch (no per-layer read-side cast).
        if l == 0:
            x_b = x_ref[...].astype(jnp.bfloat16)
        else:
            x_b = x_scr[...]

        # aggr='add' over incoming edges as a dense matmul with A[dst, src].
        # Re-read adj_ref each layer: bounded live range, fed from vld slots.
        h = jnp.dot(adj_ref[...], x_b, preferred_element_type=jnp.float32)

        # Single K=2*DPAD=256 matmul: [h | x] @ [Ws.T ; Wd.T], f32 accumulate.
        hx = jnp.concatenate([h.astype(jnp.bfloat16), x_b], axis=-1)
        out = jnp.dot(hx, w_ref[l], preferred_element_type=jnp.float32)
        out = out + b_ref[l]                 # f32 epilogue (v5e: no bf16 VPU)

        if l != num_layers - 1:
            # leaky_relu for slope < 1: max(out, slope*out) (1 vmul + 1 vmax).
            out = jnp.maximum(out, negative_slope * out)
            x_scr[...] = out.astype(jnp.bfloat16)
        else:
            o_ref[...] = out


# ------------------------------- wrapper -------------------------------------

def pack_params(params):
    """Host-side one-time packing of per-layer weights into padded stacks.

    w_stack[l, :din, :dout]            = lin_src.weight.T  (multiplies h=A@x)
    w_stack[l, DPAD:DPAD+din, :dout]   = lin_dst.weight.T  (multiplies x)
    """
    num_layers = len(params)
    w_stack = np.zeros((num_layers, 2 * DPAD, DPAD), np.float32)
    b_stack = np.zeros((num_layers, 1, DPAD), np.float32)
    for l, (w_src, w_dst, bias) in enumerate(params):
        dout, din = w_src.shape
        w_stack[l, :din, :dout] = np.asarray(w_src).T
        w_stack[l, DPAD:DPAD + din, :dout] = np.asarray(w_dst).T
        b_stack[l, 0, :dout] = np.asarray(bias)
    return jnp.asarray(w_stack, dtype=jnp.bfloat16), jnp.asarray(b_stack)


@functools.partial(jax.jit, static_argnames=("out_dim", "negative_slope"))
def graph_conv_net_forward(x, edge_index, w_stack, b_stack, *, out_dim,
                           negative_slope=0.01):
    """Mirror of GraphConvNet.forward for pooling=None / return_batch=False."""
    num_nodes, din0 = x.shape
    num_layers = w_stack.shape[0]

    # bf16 MXU operands pack 16 rows per sublane group: pad N to mult of 16.
    n_pad = max(16, ((num_nodes + 15) // 16) * 16)

    # Dense adjacency A[dst, src]: .add(1.0) reproduces aggr='add' including
    # duplicate edges. Small integer counts (< 256) are exact in bf16.
    src, dst = edge_index[0], edge_index[1]
    adj = (jnp.zeros((n_pad, n_pad), jnp.float32)
           .at[dst, src].add(1.0)
           .astype(jnp.bfloat16))

    # Zero-pad node features to lane-dense [Npad, DPAD].
    x_pad = (jnp.zeros((n_pad, DPAD), jnp.float32)
             .at[:num_nodes, :din0].set(x.astype(jnp.float32)))

    flops = num_layers * (2 * n_pad * n_pad * DPAD           # A @ X
                          + 2 * n_pad * (2 * DPAD) * DPAD    # [h|x] @ W
                          + 4 * n_pad * DPAD)                # bias + leaky_relu
    bytes_accessed = (n_pad * n_pad * 2                      # adj (bf16)
                      + n_pad * DPAD * 4                     # x in (f32)
                      + num_layers * 2 * DPAD * DPAD * 2     # weights (bf16)
                      + num_layers * DPAD * 4                # bias (f32)
                      + n_pad * DPAD * 4)                    # out (f32)

    out_pad = pl.pallas_call(
        functools.partial(_fused_gcn_kernel,
                          num_layers=num_layers,
                          negative_slope=negative_slope),
        out_shape=jax.ShapeDtypeStruct((n_pad, DPAD), jnp.float32),
        in_specs=[pl.BlockSpec(memory_space=pltpu.MemorySpace.VMEM)] * 4,
        out_specs=pl.BlockSpec(memory_space=pltpu.MemorySpace.VMEM),
        scratch_shapes=[pltpu.VMEM((n_pad, DPAD), jnp.bfloat16)],
        cost_estimate=pl.CostEstimate(flops=flops, transcendentals=0,
                                      bytes_accessed=bytes_accessed),
    )(adj, x_pad, w_stack, b_stack)

    return out_pad[:num_nodes, :out_dim]


# --------------------------- parameter setup (glue) --------------------------

def orthogonal_init(key, shape):
    """Deterministic equivalent of nn.init.orthogonal_ for a [out, in] weight."""
    rows, cols = shape
    a = jax.random.normal(key, (rows, cols), dtype=jnp.float32)
    if rows < cols:
        a = a.T
    q, r = jnp.linalg.qr(a)
    d = jnp.sign(jnp.diagonal(r))
    d = jnp.where(d == 0, 1.0, d)            # guard against exact-zero diag
    q = q * d
    if rows < cols:
        q = q.T
    return q[:rows, :cols]


def make_params(key, input_dim, output_dim, embedding_dim, num_layers):
    dims = []
    for layer_id in range(num_layers):
        if num_layers == 1:
            dims.append((input_dim, output_dim))
        elif layer_id == 0:
            dims.append((input_dim, embedding_dim))
        elif layer_id == num_layers - 1:
            dims.append((embedding_dim, output_dim))
        else:
            dims.append((embedding_dim, embedding_dim))
    params = []
    for din, dout in dims:
        k1, k2, key = jax.random.split(key, 3)
        w_src = orthogonal_init(k1, (dout, din))   # nn.Linear layout [out, in]
        w_dst = orthogonal_init(k2, (dout, din))
        bias = jnp.zeros((dout,), dtype=jnp.float32)
        params.append((w_src, w_dst, bias))
    return params


# --------------------------------- main --------------------------------------

if __name__ == "__main__":
    key = jax.random.PRNGKey(0)
    k_x, k_e, k_p = jax.random.split(key, 3)

    num_nodes = 16
    num_edges = 40
    input_dim = 4
    embedding_dim = 32
    output_dim = 8
    num_layers = 3

    x = jax.random.normal(k_x, (num_nodes, input_dim), dtype=jnp.float32)
    edge_index = jax.random.randint(k_e, (2, num_edges), 0, num_nodes,
                                    dtype=jnp.int32)

    params = make_params(k_p, input_dim, output_dim, embedding_dim, num_layers)
    # Hoisted out of the per-forward path: packed once, reused every call.
    w_stack, b_stack = pack_params(params)

    out = graph_conv_net_forward(x, edge_index, w_stack, b_stack,
                                 out_dim=output_dim)
    out = jax.block_until_ready(out)
    assert out.shape == (num_nodes, output_dim)
    assert jnp.all(jnp.isfinite(out))
    print("KERNEL_OK")
</pallas_src>

<mosaic_0001>
module attributes {stable_mosaic.version = 11 : i64} {
  func.func @_fused_gcn_kernel(%arg0: memref<16x16xbf16, #tpu.memory_space<vmem>>, %arg1: memref<16x128xf32, #tpu.memory_space<vmem>>, %arg2: memref<3x256x128xbf16, #tpu.memory_space<vmem>>, %arg3: memref<3x1x128xf32, #tpu.memory_space<vmem>>, %arg4: memref<16x128xf32, #tpu.memory_space<vmem>>, %arg5: memref<16x128xbf16, #tpu.memory_space<vmem>>) attributes {dimension_semantics = [], scalar_prefetch = 0 : i64, scratch_operands = 1 : i64, tpu.core_type = #tpu.core_type<tc>} {
    %c0 = arith.constant 0 : index
    %c0_0 = arith.constant 0 : index
    %0 = vector.load %arg1[%c0, %c0_0] : memref<16x128xf32, #tpu.memory_space<vmem>>, vector<16x128xf32>
    %1 = arith.truncf %0 : vector<16x128xf32> to vector<16x128xbf16>
    %c0_1 = arith.constant 0 : index
    %c0_2 = arith.constant 0 : index
    %2 = vector.load %arg0[%c0_1, %c0_2] : memref<16x16xbf16, #tpu.memory_space<vmem>>, vector<16x16xbf16>
    %cst = arith.constant dense<0.000000e+00> : vector<16x128xf32>
    %3 = tpu.matmul %2, %1, %cst {dimension_numbers = #tpu.dot_dimension_numbers<[1], [0], [0], [1], [0, 0, 1, 1], [], []>} : vector<16x16xbf16>, vector<16x128xbf16>, vector<16x128xf32> -> vector<16x128xf32>
    %4 = arith.truncf %3 : vector<16x128xf32> to vector<16x128xbf16>
    %5 = tpu.concatenate %4, %1 in 1 : vector<16x128xbf16>, vector<16x128xbf16> -> vector<16x256xbf16>
    %c0_3 = arith.constant 0 : index
    %c0_4 = arith.constant 0 : index
    %c0_5 = arith.constant 0 : index
    %6 = vector.load %arg2[%c0_3, %c0_4, %c0_5] : memref<3x256x128xbf16, #tpu.memory_space<vmem>>, vector<1x256x128xbf16>
    %7 = vector.shape_cast %6 : vector<1x256x128xbf16> to vector<256x128xbf16>
    %cst_6 = arith.constant dense<0.000000e+00> : vector<16x128xf32>
    %8 = tpu.matmul %5, %7, %cst_6 {dimension_numbers = #tpu.dot_dimension_numbers<[1], [0], [0], [1], [0, 0, 1, 1], [], []>} : vector<16x256xbf16>, vector<256x128xbf16>, vector<16x128xf32> -> vector<16x128xf32>
    %c0_7 = arith.constant 0 : index
    %c0_8 = arith.constant 0 : index
    %c0_9 = arith.constant 0 : index
    %9 = vector.load %arg3[%c0_7, %c0_8, %c0_9] : memref<3x1x128xf32, #tpu.memory_space<vmem>>, vector<1x1x128xf32>
    %10 = vector.shape_cast %9 : vector<1x1x128xf32> to vector<1x128xf32>
    %11 = vector.broadcast %10 : vector<1x128xf32> to vector<16x128xf32>
    %12 = arith.addf %8, %11 : vector<16x128xf32>
    %cst_10 = arith.constant 0.00999999977 : f32
    %13 = vector.broadcast %cst_10 : f32 to vector<16x128xf32>
    %14 = arith.mulf %13, %12 : vector<16x128xf32>
    %15 = arith.maximumf %12, %14 : vector<16x128xf32>
    %16 = arith.truncf %15 : vector<16x128xf32> to vector<16x128xbf16>
    %c0_11 = arith.constant 0 : index
    %c0_12 = arith.constant 0 : index
    %17 = vector.load %arg5[%c0_11, %c0_12] : memref<16x128xbf16, #tpu.memory_space<vmem>>, vector<16x128xbf16>
    tpu.vector_store %arg5[%c0_11, %c0_12], %16 {strides = array<i32>} : memref<16x128xbf16, #tpu.memory_space<vmem>>, vector<16x128xbf16>,
    %c0_13 = arith.constant 0 : index
    %c0_14 = arith.constant 0 : index
    %18 = vector.load %arg5[%c0_13, %c0_14] : memref<16x128xbf16, #tpu.memory_space<vmem>>, vector<16x128xbf16>
    %c0_15 = arith.constant 0 : index
    %c0_16 = arith.constant 0 : index
    %19 = vector.load %arg0[%c0_15, %c0_16] : memref<16x16xbf16, #tpu.memory_space<vmem>>, vector<16x16xbf16>
    %cst_17 = arith.constant dense<0.000000e+00> : vector<16x128xf32>
    %20 = tpu.matmul %19, %18, %cst_17 {dimension_numbers = #tpu.dot_dimension_numbers<[1], [0], [0], [1], [0, 0, 1, 1], [], []>} : vector<16x16xbf16>, vector<16x128xbf16>, vector<16x128xf32> -> vector<16x128xf32>
    %21 = arith.truncf %20 : vector<16x128xf32> to vector<16x128xbf16>
    %22 = tpu.concatenate %21, %18 in 1 : vector<16x128xbf16>, vector<16x128xbf16> -> vector<16x256xbf16>
    %c1 = arith.constant 1 : index
    %c0_18 = arith.constant 0 : index
    %c0_19 = arith.constant 0 : index
    %23 = vector.load %arg2[%c1, %c0_18, %c0_19] : memref<3x256x128xbf16, #tpu.memory_space<vmem>>, vector<1x256x128xbf16>
    %24 = vector.shape_cast %23 : vector<1x256x128xbf16> to vector<256x128xbf16>
    %cst_20 = arith.constant dense<0.000000e+00> : vector<16x128xf32>
    %25 = tpu.matmul %22, %24, %cst_20 {dimension_numbers = #tpu.dot_dimension_numbers<[1], [0], [0], [1], [0, 0, 1, 1], [], []>} : vector<16x256xbf16>, vector<256x128xbf16>, vector<16x128xf32> -> vector<16x128xf32>
    %c1_21 = arith.constant 1 : index
    %c0_22 = arith.constant 0 : index
    %c0_23 = arith.constant 0 : index
    %26 = vector.load %arg3[%c1_21, %c0_22, %c0_23] : memref<3x1x128xf32, #tpu.memory_space<vmem>>, vector<1x1x128xf32>
    %27 = vector.shape_cast %26 : vector<1x1x128xf32> to vector<1x128xf32>
    %28 = vector.broadcast %27 : vector<1x128xf32> to vector<16x128xf32>
    %29 = arith.addf %25, %28 : vector<16x128xf32>
    %cst_24 = arith.constant 0.00999999977 : f32
    %30 = vector.broadcast %cst_24 : f32 to vector<16x128xf32>
    %31 = arith.mulf %30, %29 : vector<16x128xf32>
    %32 = arith.maximumf %29, %31 : vector<16x128xf32>
    %33 = arith.truncf %32 : vector<16x128xf32> to vector<16x128xbf16>
    %c0_25 = arith.constant 0 : index
    %c0_26 = arith.constant 0 : index
    %34 = vector.load %arg5[%c0_25, %c0_26] : memref<16x128xbf16, #tpu.memory_space<vmem>>, vector<16x128xbf16>
    tpu.vector_store %arg5[%c0_25, %c0_26], %33 {strides = array<i32>} : memref<16x128xbf16, #tpu.memory_space<vmem>>, vector<16x128xbf16>,
    %c0_27 = arith.constant 0 : index
    %c0_28 = arith.constant 0 : index
    %35 = vector.load %arg5[%c0_27, %c0_28] : memref<16x128xbf16, #tpu.memory_space<vmem>>, vector<16x128xbf16>
    %c0_29 = arith.constant 0 : index
    %c0_30 = arith.constant 0 : index
    %36 = vector.load %arg0[%c0_29, %c0_30] : memref<16x16xbf16, #tpu.memory_space<vmem>>, vector<16x16xbf16>
    %cst_31 = arith.constant dense<0.000000e+00> : vector<16x128xf32>
    %37 = tpu.matmul %36, %35, %cst_31 {dimension_numbers = #tpu.dot_dimension_numbers<[1], [0], [0], [1], [0, 0, 1, 1], [], []>} : vector<16x16xbf16>, vector<16x128xbf16>, vector<16x128xf32> -> vector<16x128xf32>
    %38 = arith.truncf %37 : vector<16x128xf32> to vector<16x128xbf16>
    %39 = tpu.concatenate %38, %35 in 1 : vector<16x128xbf16>, vector<16x128xbf16> -> vector<16x256xbf16>
    %c2 = arith.constant 2 : index
    %c0_32 = arith.constant 0 : index
    %c0_33 = arith.constant 0 : index
    %40 = vector.load %arg2[%c2, %c0_32, %c0_33] : memref<3x256x128xbf16, #tpu.memory_space<vmem>>, vector<1x256x128xbf16>
    %41 = vector.shape_cast %40 : vector<1x256x128xbf16> to vector<256x128xbf16>
    %cst_34 = arith.constant dense<0.000000e+00> : vector<16x128xf32>
    %42 = tpu.matmul %39, %41, %cst_34 {dimension_numbers = #tpu.dot_dimension_numbers<[1], [0], [0], [1], [0, 0, 1, 1], [], []>} : vector<16x256xbf16>, vector<256x128xbf16>, vector<16x128xf32> -> vector<16x128xf32>
    %c2_35 = arith.constant 2 : index
    %c0_36 = arith.constant 0 : index
    %c0_37 = arith.constant 0 : index
    %43 = vector.load %arg3[%c2_35, %c0_36, %c0_37] : memref<3x1x128xf32, #tpu.memory_space<vmem>>, vector<1x1x128xf32>
    %44 = vector.shape_cast %43 : vector<1x1x128xf32> to vector<1x128xf32>
    %45 = vector.broadcast %44 : vector<1x128xf32> to vector<16x128xf32>
    %46 = arith.addf %42, %45 : vector<16x128xf32>
    %c0_38 = arith.constant 0 : index
    %c0_39 = arith.constant 0 : index
    %47 = vector.load %arg4[%c0_38, %c0_39] : memref<16x128xf32, #tpu.memory_space<vmem>>, vector<16x128xf32>
    tpu.vector_store %arg4[%c0_38, %c0_39], %46 {strides = array<i32>} : memref<16x128xf32, #tpu.memory_space<vmem>>, vector<16x128xf32>,
    return
  }
}

</mosaic_0001>

<bundles_post_ra>
// kernel: graph_conv_net_forward.1
= control target key start
LH: loop header
LB: loop body
LE: loop exit
PB: predicated region body
PF: predicated region fallthrough
CT: control target
= control target key end

     0   :  { %v996_v0 = vmov 0.0   ;;  %vm997_vm0 = vmmov 0   ;;  %vm28_vm1 = vcmask 130048   ;;  %s1209_s1 = inlined_call_operand.vmem [shape: f32[16,128], index: 1, kind: input, shape index: {}]   ;;  %s1210_s0 = inlined_call_operand.vmem [shape: bf16[16,16], index: 0, kind: input, shape index: {}]   ;;  %s1211_s2 = inlined_call_operand.vmem [shape: bf16[3,256,128], index: 2, kind: input, shape index: {}]   ;;  %s1212_s3 = inlined_call_operand.vmem [shape: f32[3,1,128], index: 3, kind: input, shape index: {}]   ;;  %s1213_s4 = inlined_call_operand.vmem [shape: f32[16,128], index: 4, kind: output, shape index: {}]  }
   0x1   :  { %925 = vmatprep.subr.bf16.mxu0 %v996_v0  ;;  %v18_v1 = vld [vmem:[%s1209_s1] sm:$0xff]  ;;  %v19_v2 = vld [vmem:[%s1209_s1 + $0x8] sm:$0xff]  ;;  %927 = vmatprep.mubr.msk.bf16.mxu0 %vm997_vm0, %v996_v0  ;;  %v950_v9 = vld [vmem:[%s1211_s2 + $0x50] sm:$0xff]  }
   0x2   :  { %v20_v3 = vpack.c.bf16 %v19_v2, %v18_v1  ;;  %v945_v4 = vld [vmem:[%s1210_s0] sm:$0xff]   ;;  %v948_v7 = vld [vmem:[%s1211_s2 + $0x48] sm:$0xff]   ;;  %v951_v10 = vld [vmem:[%s1211_s2 + $0x10] sm:$0xff]  }
   0x3   :  { %v946_v5 = vld [vmem:[%s1211_s2 + $0x40] sm:$0xff]   ;;  %v949_v8 = vld [vmem:[%s1211_s2 + $0x8] sm:$0xff]   ;;  %v952_v11 = vld [vmem:[%s1211_s2 + $0x58] sm:$0xff]  }
   0x4   :  { %926 = vmatpush3.bf16.msra.mxu0 %v20_v3  ;;  %v947_v6 = vld [vmem:[%s1211_s2] sm:$0xff]   ;;  %241 = vmatprep.mubr.bf16.mxu1 %v20_v3  ;;  %v953_v12 = vld [vmem:[%s1211_s2 + $0x18] sm:$0xff]   ;;  %v956_v15 = vld [vmem:[%s1211_s2 + $0x68] sm:$0xff]  }
   0x5   :  { %855 = vmatprep.subr.bf16.mxu1 %v946_v5  ;;  %931 = vmatprep.subr.bf16.mxu0 %v996_v0  ;;  %v954_v13 = vld [vmem:[%s1211_s2 + $0x60] sm:$0xff]   ;;  %v957_v16 = vld [vmem:[%s1211_s2 + $0x28] sm:$0xff]   ;;  %v958_v17 = vld [vmem:[%s1211_s2 + $0x70] sm:$0xff]  }
   0x6   :  { %856 = vmatpush3.bf16.msra.mxu1 %v947_v6  ;;  %v955_v14 = vld [vmem:[%s1211_s2 + $0x20] sm:$0xff]   ;;  %v959_v18 = vld [vmem:[%s1211_s2 + $0x30] sm:$0xff]   ;;  %v960_v19 = vld [vmem:[%s1211_s2 + $0x78] sm:$0xff]  }
   0x7   :  { %928 = vmatmul.mubr.msk.bf16.vlgmr.msra.gmra.mrb[0].mxu0 %vm28_vm1, %v945_v4  ;;  %857 = vmatprep.subr.bf16.mxu1 %v948_v7  ;;  %v961_v20 = vld [vmem:[%s1211_s2 + $0x38] sm:$0xff]   ;;  %v732_v27 = vld [vmem:[%s1212_s3] ss:$0 sm:$0xff]  ;;  %v965_v43 = vld [vmem:[%s1211_s2 + $0xc8] sm:$0xff]  }
   0x8   :  { %933 = vmatprep.mubr.msk.bf16.mxu0 %vm997_vm0, %v996_v0  ;;  %v963_v39 = vld [vmem:[%s1211_s2 + $0xc0] sm:$0xff]   ;;  %v966_v44 = vld [vmem:[%s1211_s2 + $0x88] sm:$0xff]   ;;  %v967_v45 = vld [vmem:[%s1211_s2 + $0xd0] sm:$0xff]  }
   0x9   :  { %v962_v41 = vld [vmem:[%s1210_s0] sm:$0xff]   ;;  %v968_v46 = vld [vmem:[%s1211_s2 + $0x90] sm:$0xff]   ;;  %v969_v47 = vld [vmem:[%s1211_s2 + $0xd8] sm:$0xff]  }
   0xa   :  { %858 = vmatpush3.bf16.msra.mxu1 %v949_v8  ;;  %v964_v42 = vld [vmem:[%s1211_s2 + $0x80] sm:$0xff]   ;;  %v970_v48 = vld [vmem:[%s1211_s2 + $0x98] sm:$0xff]   ;;  %v973_v51 = vld [vmem:[%s1211_s2 + $0xe8] sm:$0xff]  }
   0xb   :  { %859 = vmatprep.subr.bf16.mxu1 %v950_v9  ;;  %v971_v49 = vld [vmem:[%s1211_s2 + $0xe0] sm:$0xff]   ;;  %v974_v52 = vld [vmem:[%s1211_s2 + $0xa8] sm:$0xff]   ;;  %v975_v53 = vld [vmem:[%s1211_s2 + $0xf0] sm:$0xff]  }
   0xc   :  { %v972_v50 = vld [vmem:[%s1211_s2 + $0xa0] sm:$0xff]   ;;  %v976_v54 = vld [vmem:[%s1211_s2 + $0xb0] sm:$0xff]   ;;  %v977_v55 = vld [vmem:[%s1211_s2 + $0xf8] sm:$0xff]  }
   0xd   :  { %v978_v56 = vld [vmem:[%s1211_s2 + $0xb8] sm:$0xff]   ;;  %v980_v62 = vld [vmem:[%s1211_s2 + $0x140] sm:$0xff]   ;;  %v982_v1 = vld [vmem:[%s1211_s2 + $0x148] sm:$0xff]  }
   0xe   :  { %860 = vmatpush3.bf16.msra.mxu1 %v951_v10  ;;  %v981_v63 = vld [vmem:[%s1211_s2 + $0x100] sm:$0xff]   ;;  %v983_v2 = vld [vmem:[%s1211_s2 + $0x108] sm:$0xff]   ;;  %v985_v3 = vld [vmem:[%s1211_s2 + $0x110] sm:$0xff]  }
   0xf   :  { %861 = vmatprep.subr.bf16.mxu1 %v952_v11  ;;  %v986_v4 = vld [vmem:[%s1211_s2 + $0x158] sm:$0xff]   ;;  %v988_v6 = vld [vmem:[%s1211_s2 + $0x160] sm:$0xff]   ;;  %v990_v8 = vld [vmem:[%s1211_s2 + $0x168] sm:$0xff]  }
  0x10   :  { %v987_v5 = vld [vmem:[%s1211_s2 + $0x118] sm:$0xff]   ;;  %v989_v7 = vld [vmem:[%s1211_s2 + $0x120] sm:$0xff]   ;;  %v991_v9 = vld [vmem:[%s1211_s2 + $0x128] sm:$0xff]  }
  0x11   :  { %v992_v10 = vld [vmem:[%s1211_s2 + $0x170] sm:$0xff]  }
  0x12   :  { %862 = vmatpush3.bf16.msra.mxu1 %v953_v12  ;;  %v993_v11 = vld [vmem:[%s1211_s2 + $0x130] sm:$0xff]  }
  0x13   :  { %863 = vmatprep.subr.bf16.mxu1 %v954_v13  ;;  %v784_v13 = vld [vmem:[%s1212_s3 + $0x1] ss:$0 sm:$0xff] }
  0x16   :  { %864 = vmatpush3.bf16.msra.mxu1 %v955_v14 }
  0x17   :  { %865 = vmatprep.subr.bf16.mxu1 %v956_v15 }
  0x1a   :  { %866 = vmatpush3.bf16.msra.mxu1 %v957_v16 }
  0x1b   :  { %867 = vmatprep.subr.bf16.mxu1 %v958_v17 }
  0x1e   :  { %868 = vmatpush3.bf16.msra.mxu1 %v959_v18 }
  0x1f   :  { %869 = vmatprep.subr.bf16.mxu1 %v960_v19 }
  0x22   :  { %870 = vmatpush3.bf16.msra.mxu1 %v961_v20 }
  0x23   :  { %903 = vmatprep.subr.bf16.mxu1 %v980_v62 }
  0xda   :  { %v66_v21 = vpop.f32.mrb[0].mxu0 }
  0xdb   :  { %v929_v22 = vpop.f32.mrb[1].mxu0 }
  0xdc   :  { %v69_v23 = vpop.f32.mrb[2].mxu0 }
  0xdd   :  { %v73_v24 = vpack.c.bf16 %v69_v23, %v66_v21  ;;  %v930_v25 = vpop.f32.mrb[3].mxu0 }
  0xdf   :  { %242 = vmatmul.mubr.bf16.vlgmr.msra.gmra.mrb[0].mxu1 %v73_v24 }
  0xe0   :  { %904 = vmatpush3.bf16.msra.mxu1 %v981_v63 }
  0xe1   :  { %905 = vmatprep.subr.bf16.mxu1 %v982_v1 }
  0xe4   :  { %906 = vmatpush3.bf16.msra.mxu1 %v983_v2 }
 0x1b2   :  { %v871_v26 = vpop.f32.mrb[0].mxu1 }
 0x1b3   :  { %v872_v28 = vpop.f32.mrb[1].mxu1 }
 0x1b4   :  { %v873_v29 = vadd.f32 %v872_v28, %v871_v26  ;;  %v874_v30 = vpop.f32.mrb[2].mxu1  ;;  %v979_v26 = vld [vmem:[%s1210_s0] sm:$0xff]   ;;  %v995_v28 = vld [vmem:[%s1211_s2 + $0x138] sm:$0xff]  }
 0x1b5   :  { %v875_v31 = vpop.f32.mrb[3].mxu1 }
 0x1b6   :  { %v244_v32 = vadd.f32 %v873_v29, %v732_v27  ;;  %v876_v33 = vadd.f32 %v875_v31, %v874_v30 }
 0x1b8   :  { %v250_v34 = vmul.f32 0.01, %v244_v32  ;;  %v247_v35 = vadd.f32 %v876_v33, %v732_v27  ;;  %v994_v27 = vld [vmem:[%s1211_s2 + $0x178] sm:$0xff]  }
 0x1ba   :  { %v251_v36 = vmul.f32 0.01, %v247_v35  ;;  %v252_v37 = vmax.f32 %v244_v32, %v250_v34 }
 0x1bc   :  { %v253_v38 = vmax.f32 %v247_v35, %v251_v36  ;;  %v836_v35 = vld [vmem:[%s1212_s3 + $0x2] ss:$0 sm:$0xff] }
 0x1be   :  { %v254_v40 = vpack.c.bf16 %v253_v38, %v252_v37 }
 0x1c0   :  { %932 = vmatpush3.bf16.msra.mxu0 %v254_v40 }
 0x1c1   :  { %879 = vmatprep.subr.bf16.mxu0 %v963_v39 }
 0x1c3   :  { %934 = vmatmul.mubr.msk.bf16.vlgmr.msra.gmra.mrb[4].mxu0 %vm28_vm1, %v962_v41 }
 0x1c4   :  { %478 = vmatprep.mubr.bf16.mxu0 %v254_v40  ;;  %880 = vmatpush3.bf16.msra.mxu0 %v964_v42 }
 0x1c5   :  { %881 = vmatprep.subr.bf16.mxu0 %v965_v43 }
 0x1c8   :  { %882 = vmatpush3.bf16.msra.mxu0 %v966_v44 }
 0x1c9   :  { %883 = vmatprep.subr.bf16.mxu0 %v967_v45 }
 0x1cc   :  { %884 = vmatpush3.bf16.msra.mxu0 %v968_v46 }
 0x1cd   :  { %885 = vmatprep.subr.bf16.mxu0 %v969_v47 }
 0x1d0   :  { %886 = vmatpush3.bf16.msra.mxu0 %v970_v48 }
 0x1d1   :  { %887 = vmatprep.subr.bf16.mxu0 %v971_v49 }
 0x1d4   :  { %888 = vmatpush3.bf16.msra.mxu0 %v972_v50 }
 0x1d5   :  { %889 = vmatprep.subr.bf16.mxu0 %v973_v51 }
 0x1d8   :  { %890 = vmatpush3.bf16.msra.mxu0 %v974_v52 }
 0x1d9   :  { %891 = vmatprep.subr.bf16.mxu0 %v975_v53 }
 0x1dc   :  { %892 = vmatpush3.bf16.msra.mxu0 %v976_v54 }
 0x1dd   :  { %893 = vmatprep.subr.bf16.mxu0 %v977_v55 }
 0x1e0   :  { %894 = vmatpush3.bf16.msra.mxu0 %v978_v56 }
 0x1e1   :  { %937 = vmatprep.subr.bf16.mxu0 %v996_v0 }
 0x296   :  { %v301_v57 = vpop.f32.mrb[4].mxu0 }
 0x297   :  { %v935_v58 = vpop.f32.mrb[5].mxu0 }
 0x298   :  { %v304_v59 = vpop.f32.mrb[6].mxu0 }
 0x299   :  { %v308_v60 = vpack.c.bf16 %v304_v59, %v301_v57  ;;  %v936_v61 = vpop.f32.mrb[7].mxu0 }
 0x29b   :  { %479 = vmatmul.mubr.bf16.vlgmr.msra.gmra.mrb[8].mxu0 %v308_v60 }
 0x29c   :  { %939 = vmatprep.mubr.msk.bf16.mxu0 %vm997_vm0, %v996_v0  ;;  %v984_v0 = vld [vmem:[%s1211_s2 + $0x150] sm:$0xff]  }
 0x29d   :  { %907 = vmatprep.subr.bf16.mxu1 %v984_v0 }
 0x29e   :  { %908 = vmatpush3.bf16.msra.mxu1 %v985_v3 }
 0x29f   :  { %909 = vmatprep.subr.bf16.mxu1 %v986_v4 }
 0x2a2   :  { %910 = vmatpush3.bf16.msra.mxu1 %v987_v5 }
 0x2a3   :  { %911 = vmatprep.subr.bf16.mxu1 %v988_v6 }
 0x2a6   :  { %912 = vmatpush3.bf16.msra.mxu1 %v989_v7 }
 0x2a7   :  { %913 = vmatprep.subr.bf16.mxu1 %v990_v8 }
 0x2aa   :  { %914 = vmatpush3.bf16.msra.mxu1 %v991_v9 }
 0x2ab   :  { %915 = vmatprep.subr.bf16.mxu1 %v992_v10 }
 0x2ae   :  { %916 = vmatpush3.bf16.msra.mxu1 %v993_v11 }
 0x2af   :  { %917 = vmatprep.subr.bf16.mxu1 %v994_v27 }
 0x2b2   :  { %918 = vmatpush3.bf16.msra.mxu1 %v995_v28 }
 0x36e   :  { %v895_v12 = vpop.f32.mrb[8].mxu0 }
 0x36f   :  { %v896_v14 = vpop.f32.mrb[9].mxu0 }
 0x370   :  { %v897_v15 = vadd.f32 %v896_v14, %v895_v12  ;;  %v898_v16 = vpop.f32.mrb[10].mxu0 }
 0x371   :  { %v899_v17 = vpop.f32.mrb[11].mxu0 }
 0x372   :  { %v481_v18 = vadd.f32 %v897_v15, %v784_v13  ;;  %v900_v19 = vadd.f32 %v899_v17, %v898_v16 }
 0x374   :  { %v487_v20 = vmul.f32 0.01, %v481_v18  ;;  %v484_v21 = vadd.f32 %v900_v19, %v784_v13 }
 0x376   :  { %v488_v22 = vmul.f32 0.01, %v484_v21  ;;  %v489_v23 = vmax.f32 %v481_v18, %v487_v20 }
 0x378   :  { %v490_v24 = vmax.f32 %v484_v21, %v488_v22 }
 0x37a   :  { %v491_v25 = vpack.c.bf16 %v490_v24, %v489_v23 }
 0x37c   :  { %938 = vmatpush3.bf16.msra.mxu0 %v491_v25  ;;  %715 = vmatprep.mubr.bf16.mxu1 %v491_v25 }
 0x37f   :  { %940 = vmatmul.mubr.msk.bf16.vlgmr.msra.gmra.mrb[12].mxu0 %vm28_vm1, %v979_v26 }
 0x452   :  { %v538_v29 = vpop.f32.mrb[12].mxu0 }
 0x453   :  { %v941_v30 = vpop.f32.mrb[13].mxu0 }
 0x454   :  { %v541_v31 = vpop.f32.mrb[14].mxu0 }
 0x455   :  { %v545_v32 = vpack.c.bf16 %v541_v31, %v538_v29  ;;  %v942_v33 = vpop.f32.mrb[15].mxu0 }
 0x457   :  { %716 = vmatmul.mubr.bf16.vlgmr.msra.gmra.mrb[4].mxu1 %v545_v32 }
 0x52a   :  { %v919_v34 = vpop.f32.mrb[4].mxu1 }
 0x52b   :  { %v920_v36 = vpop.f32.mrb[5].mxu1 }
 0x52c   :  { %v921_v37 = vadd.f32 %v920_v36, %v919_v34  ;;  %v922_v38 = vpop.f32.mrb[6].mxu1 }
 0x52d   :  { %v923_v39 = vpop.f32.mrb[7].mxu1 }
 0x52e   :  { %v718_v40 = vadd.f32 %v921_v37, %v836_v35  ;;  %v924_v41 = vadd.f32 %v923_v39, %v922_v38 }
 0x530   :  { %724 = vst [vmem:[%s1213_s4] sm:$0xff] %v718_v40  ;;  %v721_v42 = vadd.f32 %v924_v41, %v836_v35 }
 0x532   :  { %725 = vst [vmem:[%s1213_s4 + $0x8] sm:$0xff] %v721_v42 }

</bundles_post_ra>
